<compile_context>
chip_gen: v7x
topology: tpu7x:2x2x1
jax: 0.10.0
libtpu: 0.0.40
codegen_flags: <defaults>
</compile_context>

<pallas_src>
import functools

import jax
import jax.numpy as jnp
from jax.experimental import pallas as pl
from jax.experimental.pallas import tpu as pltpu


def _gemm_dequant_kernel(p_ref, w_ref, s_ref, b_ref, o_ref, acc_ref):
    """One (TM, TN) output tile of dequant(patches @ weight), K-tiled.

    p_ref : (TM, TK)  int8 patches tile
    w_ref : (TK, TN)  int8 weight tile (cast to bf16 in-kernel on the fp path)
    s_ref : (1, TN)   f32 per-out-channel scale
    b_ref : (1, TN)   int32 per-out-channel bias
    o_ref : (TM, TN)  output tile (out_dtype)
    acc_ref: (TM, TN) int32 (int8 MXU path) or f32 (bf16 MXU path) scratch
    """
    int_path = jnp.issubdtype(acc_ref.dtype, jnp.integer)

    @pl.when(pl.program_id(2) == 0)
    def _():
        acc_ref[...] = jnp.zeros_like(acc_ref)

    if int_path:
        lhs = p_ref[...]
        rhs = w_ref[...]
    else:
        # No native int MXU path (e.g. v7x): bf16 is exact for int8 operands,
        # products exact in the f32 accumulator.
        lhs = p_ref[...].astype(jnp.bfloat16)
        rhs = w_ref[...].astype(jnp.bfloat16)
    acc_ref[...] += jnp.dot(lhs, rhs, preferred_element_type=acc_ref.dtype)

    @pl.when(pl.program_id(2) == pl.num_programs(2) - 1)
    def _():
        acc = acc_ref[...]
        if int_path:
            acc = (acc + b_ref[...]).astype(jnp.float32)   # exact int32 add
        else:
            acc = acc + b_ref[...].astype(jnp.float32)
        o_ref[...] = (acc * s_ref[...]).astype(o_ref.dtype)


def _im2col_nhwc(x_i8, oh, ow, kernel_size, stride, padding, dilation,
                 offset_x, k_cols):
    """(N, C, H, W) int8 -> patches (N*OH*OW, k_cols) int8, K index = (kh, kw, c).

    K zero-padding up to `k_cols` is folded into the single concatenation pass
    (no extra pad copy of the patches matrix).
    """
    N, C, H, W = x_i8.shape
    KH, KW = kernel_size
    SH, SW = stride
    PH, PW = padding
    DH, DW = dilation

    # One NCHW -> NHWC pass so C sits on the contiguous (lane) axis.
    x_nhwc = jnp.transpose(x_i8, (0, 2, 3, 1))
    xp = jnp.pad(x_nhwc, ((0, 0), (PH, PH), (PW, PW), (0, 0)),
                 constant_values=jnp.int8(offset_x))

    slabs = []
    for kh in range(KH):
        for kw in range(KW):
            h0 = kh * DH
            w0 = kw * DW
            slabs.append(xp[:, h0:h0 + (oh - 1) * SH + 1:SH,
                               w0:w0 + (ow - 1) * SW + 1:SW, :])   # (N,OH,OW,C)
    k = KH * KW * C
    if k_cols > k:
        slabs.append(jnp.zeros((N, oh, ow, k_cols - k), jnp.int8))
    patches = jnp.concatenate(slabs, axis=-1)       # lane-axis concat, near-free
    return patches.reshape(N * oh * ow, k_cols)


def _round_up(x, m):
    return ((x + m - 1) // m) * m


def _mxu_supports_int8():
    """v5* / v6* MXUs have a native int8 path; v7x (and older chips) do not."""
    kind = jax.devices()[0].device_kind.lower()
    return ("v5" in kind) or ("v6" in kind)


@functools.partial(
    jax.jit,
    static_argnames=("stride", "padding", "dilation", "offset_x", "out_dtype",
                     "use_int8_mxu"),
)
def _quant_conv2d_impl(x_i8, weight_i8, bias_i32, scale_f32, *, stride,
                       padding, dilation, offset_x, out_dtype, use_int8_mxu):
    N, C, H, W = x_i8.shape
    OC, _, KH, KW = weight_i8.shape
    SH, SW = stride
    PH, PW = padding
    DH, DW = dilation
    OH = (H + 2 * PH - DH * (KH - 1) - 1) // SH + 1
    OW = (W + 2 * PW - DW * (KW - 1) - 1) // SW + 1
    M = N * OH * OW
    K = C * KH * KW

    # ---- tile selection -----------------------------------------------------
    # Lane-dense OC padding; a single j step whenever OC_pad <= 1024 so the
    # patches matrix streams through the kernel exactly once.
    OC_pad = _round_up(OC, 128)
    if OC_pad <= 1024:
        TN = OC_pad
    elif OC_pad % 512 == 0:
        TN = 512
    else:
        OC_pad = _round_up(OC, 256)
        TN = 256

    # Single K step (no accumulator RMW) whenever K_pad fits a 2048-wide tile;
    # otherwise TK=512 with K zero-padded up to a multiple of 512 (exact).
    K_pad = _round_up(K, 128)
    if K_pad <= 2048:
        TK = K_pad
    else:
        TK = 512
        K_pad = _round_up(K, TK)

    # No >=2-M-steps cap; the M remainder is handled by the grid (masked
    # boundary stores), never by padding/copying the patches matrix.
    if M >= 1024:
        TM = 512
    elif M >= 512:
        TM = 256
    else:
        TM = 128

    num_j = OC_pad // TN
    num_m = (M + TM - 1) // TM
    num_k = K_pad // TK

    # ---- operand prep --------------------------------------------------------
    patches = _im2col_nhwc(x_i8, OH, OW, (KH, KW), stride, padding, dilation,
                           offset_x, K_pad)

    # Weight flattened as (KH, KW, C, OC) to match the patches K layout; it
    # stays int8 in HBM on every path (cast per tile in-kernel on the fp path).
    w_mat = jnp.transpose(weight_i8, (2, 3, 1, 0)).reshape(K, OC)
    w_mat = jnp.pad(w_mat, ((0, K_pad - K), (0, OC_pad - OC)))

    scale_row = jnp.pad(scale_f32, (0, OC_pad - OC)).reshape(1, OC_pad)
    bias_row = jnp.pad(bias_i32, (0, OC_pad - OC)).reshape(1, OC_pad)

    acc_dtype = jnp.int32 if use_int8_mxu else jnp.float32

    out_flat = pl.pallas_call(
        _gemm_dequant_kernel,
        out_shape=jax.ShapeDtypeStruct((M, OC_pad), out_dtype),
        grid_spec=pltpu.PrefetchScalarGridSpec(
            num_scalar_prefetch=0,
            grid=(num_j, num_m, num_k),
            in_specs=[
                pl.BlockSpec((TM, TK), lambda j, i, k: (i, k)),
                pl.BlockSpec((TK, TN), lambda j, i, k: (k, j)),
                pl.BlockSpec((1, TN), lambda j, i, k: (0, j)),
                pl.BlockSpec((1, TN), lambda j, i, k: (0, j)),
            ],
            out_specs=pl.BlockSpec((TM, TN), lambda j, i, k: (i, j)),
            scratch_shapes=[pltpu.VMEM((TM, TN), acc_dtype)],
        ),
        compiler_params=pltpu.CompilerParams(
            dimension_semantics=("parallel", "parallel", "arbitrary"),
            vmem_limit_bytes=32 * 1024 * 1024,
        ),
    )(patches, w_mat, scale_row, bias_row)

    out = out_flat[:, :OC].reshape(N, OH, OW, OC)
    # TODO(synk): module contract is NCHW; this final transpose is one extra
    #   HBM read+write of the output (emit NHWC if the consumer allows it).
    return jnp.transpose(out, (0, 3, 1, 2))


def quant_conv2d(x_i8, weight_i8, bias_i32, scale_f32, *, stride=(1, 1),
                 padding=(0, 0), dilation=(1, 1), groups=1, offset_x=0,
                 out_dtype=jnp.bfloat16):
    if groups != 1:
        # TODO(synk): grouped quantized conv not implemented.
        raise NotImplementedError("groups != 1 is not supported")
    if bias_i32 is None:
        bias_i32 = jnp.zeros((weight_i8.shape[0],), jnp.int32)
    return _quant_conv2d_impl(
        x_i8, weight_i8, bias_i32, scale_f32,
        stride=tuple(stride), padding=tuple(padding),
        dilation=tuple(dilation), offset_x=offset_x, out_dtype=out_dtype,
        use_int8_mxu=_mxu_supports_int8())


def _reference(x_i8, weight_i8, bias_i32, scale_f32, stride, padding,
               dilation, offset_x, out_dtype):
    """Plain-JAX reference for the same semantics."""
    xp = jnp.pad(
        x_i8,
        ((0, 0), (0, 0), (padding[0], padding[0]), (padding[1], padding[1])),
        constant_values=jnp.int8(offset_x),
    ).astype(jnp.int32)
    w = weight_i8.astype(jnp.int32)
    acc = jax.lax.conv_general_dilated(
        xp, w, window_strides=stride, padding="VALID",
        rhs_dilation=dilation,
        dimension_numbers=("NCHW", "OIHW", "NCHW"),
        preferred_element_type=jnp.int32,
    )
    acc = acc + bias_i32.reshape(1, -1, 1, 1)
    deq = acc.astype(jnp.float32) * scale_f32.reshape(1, -1, 1, 1)
    return deq.astype(out_dtype)


if __name__ == "__main__":
    key = jax.random.PRNGKey(0)
    k_x, k_w, k_b, k_s = jax.random.split(key, 4)

    # module config (small shapes consistent with the forward pass)
    N, Cin, H, W = 2, 4, 16, 16
    OC, KH, KW = 8, 3, 3
    stride, padding, dilation = (1, 1), (1, 1), (1, 1)
    offset_x = 0
    out_dtype = jnp.bfloat16   # output_dtype of the module (float dequant path)

    x = jax.random.randint(k_x, (N, Cin, H, W), -5, 6, dtype=jnp.int32).astype(jnp.int8)
    weight = jax.random.randint(k_w, (OC, Cin, KH, KW), -5, 6, dtype=jnp.int32).astype(jnp.int8)
    bias = jax.random.randint(k_b, (OC,), -10, 11, dtype=jnp.int32)
    scale = jax.random.uniform(k_s, (OC,), dtype=jnp.float32, minval=0.01, maxval=0.1)

    out = quant_conv2d(
        x, weight, bias, scale,
        stride=stride, padding=padding, dilation=dilation,
        offset_x=offset_x, out_dtype=out_dtype,
    )
    out = jax.block_until_ready(out)

    ref = _reference(x, weight, bias, scale, stride, padding, dilation,
                     offset_x, out_dtype)

    assert out.shape == (N, OC, H, W), out.shape
    assert out.dtype == out_dtype, out.dtype
    out_f32 = out.astype(jnp.float32)
    ref_f32 = ref.astype(jnp.float32)
    max_diff = float(jnp.max(jnp.abs(out_f32 - ref_f32)))
    # both sides do (acc + bias) * scale and round to bf16; allow ~1 ulp slack
    assert bool(jnp.allclose(out_f32, ref_f32, rtol=2e-2, atol=1e-1)), max_diff

    print("KERNEL_OK")
</pallas_src>

<mosaic_0001>
module attributes {stable_mosaic.version = 11 : i64} {
  func.func @_gemm_dequant_kernel(%arg0: i32, %arg1: i32, %arg2: i32, %arg3: memref<256x128xi8, #tpu.memory_space<vmem>>, %arg4: memref<128x128xi8, #tpu.memory_space<vmem>>, %arg5: memref<1x128xf32, #tpu.memory_space<vmem>>, %arg6: memref<1x128xi32, #tpu.memory_space<vmem>>, %arg7: memref<256x128xbf16, #tpu.memory_space<vmem>>, %arg8: memref<256x128xf32, #tpu.memory_space<vmem>>) attributes {dimension_semantics = [#tpu.dimension_semantics<parallel>, #tpu.dimension_semantics<parallel>, #tpu.dimension_semantics<arbitrary>], iteration_bounds = array<i64: 1, 2, 1>, scalar_prefetch = 0 : i64, scratch_operands = 1 : i64, tpu.core_type = #tpu.core_type<tc>, window_params = [{transform_indices = @transform_0, window_bounds = array<i64: 256, 128>}, {transform_indices = @transform_1, window_bounds = array<i64: 128, 128>}, {transform_indices = @transform_2, window_bounds = array<i64: 1, 128>}, {transform_indices = @transform_3, window_bounds = array<i64: 1, 128>}, {transform_indices = @transform_4, window_bounds = array<i64: 256, 128>}]} {
    %c0_i32 = arith.constant 0 : i32
    %0 = arith.cmpi eq, %arg2, %c0_i32 : i32
    %1 = arith.extui %0 : i1 to i32
    %c0_i32_0 = arith.constant 0 : i32
    %2 = arith.cmpi ne, %1, %c0_i32_0 : i32
    scf.if %2 {
      %cst_10 = arith.constant 0.000000e+00 : f32
      %14 = vector.broadcast %cst_10 : f32 to vector<256x128xf32>
      %c0_11 = arith.constant 0 : index
      %c0_12 = arith.constant 0 : index
      %15 = vector.load %arg8[%c0_11, %c0_12] : memref<256x128xf32, #tpu.memory_space<vmem>>, vector<256x128xf32>
      tpu.vector_store %arg8[%c0_11, %c0_12], %14 {strides = array<i32>} : memref<256x128xf32, #tpu.memory_space<vmem>>, vector<256x128xf32>,
    } else {
    }
    %c0 = arith.constant 0 : index
    %c0_1 = arith.constant 0 : index
    %3 = vector.load %arg3[%c0, %c0_1] : memref<256x128xi8, #tpu.memory_space<vmem>>, vector<256x128xi8>
    %4 = arith.sitofp %3 : vector<256x128xi8> to vector<256x128xbf16>
    %c0_2 = arith.constant 0 : index
    %c0_3 = arith.constant 0 : index
    %5 = vector.load %arg4[%c0_2, %c0_3] : memref<128x128xi8, #tpu.memory_space<vmem>>, vector<128x128xi8>
    %6 = arith.sitofp %5 : vector<128x128xi8> to vector<128x128xbf16>
    %c0_4 = arith.constant 0 : index
    %c0_5 = arith.constant 0 : index
    %7 = vector.load %arg8[%c0_4, %c0_5] : memref<256x128xf32, #tpu.memory_space<vmem>>, vector<256x128xf32>
    %cst = arith.constant dense<0.000000e+00> : vector<256x128xf32>
    %8 = tpu.matmul %4, %6, %cst {dimension_numbers = #tpu.dot_dimension_numbers<[1], [0], [0], [1], [0, 0, 1, 1], [], []>} : vector<256x128xbf16>, vector<128x128xbf16>, vector<256x128xf32> -> vector<256x128xf32>
    %9 = arith.addf %7, %8 : vector<256x128xf32>
    %c0_6 = arith.constant 0 : index
    %c0_7 = arith.constant 0 : index
    %10 = vector.load %arg8[%c0_6, %c0_7] : memref<256x128xf32, #tpu.memory_space<vmem>>, vector<256x128xf32>
    tpu.vector_store %arg8[%c0_6, %c0_7], %9 {strides = array<i32>} : memref<256x128xf32, #tpu.memory_space<vmem>>, vector<256x128xf32>,
    %c0_i32_8 = arith.constant 0 : i32
    %11 = arith.cmpi eq, %arg2, %c0_i32_8 : i32
    %12 = arith.extui %11 : i1 to i32
    %c0_i32_9 = arith.constant 0 : i32
    %13 = arith.cmpi ne, %12, %c0_i32_9 : i32
    scf.if %13 {
      %c0_10 = arith.constant 0 : index
      %c0_11 = arith.constant 0 : index
      %14 = vector.load %arg8[%c0_10, %c0_11] : memref<256x128xf32, #tpu.memory_space<vmem>>, vector<256x128xf32>
      %c0_12 = arith.constant 0 : index
      %c0_13 = arith.constant 0 : index
      %15 = vector.load %arg6[%c0_12, %c0_13] : memref<1x128xi32, #tpu.memory_space<vmem>>, vector<1x128xi32>
      %16 = arith.sitofp %15 : vector<1x128xi32> to vector<1x128xf32>
      %17 = vector.broadcast %16 : vector<1x128xf32> to vector<256x128xf32>
      %18 = arith.addf %14, %17 : vector<256x128xf32>
      %c0_14 = arith.constant 0 : index
      %c0_15 = arith.constant 0 : index
      %19 = vector.load %arg5[%c0_14, %c0_15] : memref<1x128xf32, #tpu.memory_space<vmem>>, vector<1x128xf32>
      %20 = vector.broadcast %19 : vector<1x128xf32> to vector<256x128xf32>
      %21 = arith.mulf %18, %20 : vector<256x128xf32>
      %22 = arith.truncf %21 : vector<256x128xf32> to vector<256x128xbf16>
      %c0_16 = arith.constant 0 : index
      %c0_17 = arith.constant 0 : index
      %23 = vector.load %arg7[%c0_16, %c0_17] : memref<256x128xbf16, #tpu.memory_space<vmem>>, vector<256x128xbf16>
      tpu.vector_store %arg7[%c0_16, %c0_17], %22 {strides = array<i32>} : memref<256x128xbf16, #tpu.memory_space<vmem>>, vector<256x128xbf16>,
    } else {
    }
    return
  }
  func.func @transform_0(%arg0: i32, %arg1: i32, %arg2: i32) -> (i32, i32) {
    %c0_i32 = arith.constant 0 : i32
    return %arg1, %arg2 : i32, i32
  }
  func.func @transform_1(%arg0: i32, %arg1: i32, %arg2: i32) -> (i32, i32) {
    %c0_i32 = arith.constant 0 : i32
    return %arg2, %arg0 : i32, i32
  }
  func.func @transform_2(%arg0: i32, %arg1: i32, %arg2: i32) -> (i32, i32) {
    %c0_i32 = arith.constant 0 : i32
    %c0_i32_0 = arith.constant 0 : i32
    return %c0_i32, %arg0 : i32, i32
  }
  func.func @transform_3(%arg0: i32, %arg1: i32, %arg2: i32) -> (i32, i32) {
    %c0_i32 = arith.constant 0 : i32
    %c0_i32_0 = arith.constant 0 : i32
    return %c0_i32, %arg0 : i32, i32
  }
  func.func @transform_4(%arg0: i32, %arg1: i32, %arg2: i32) -> (i32, i32) {
    %c0_i32 = arith.constant 0 : i32
    return %arg1, %arg0 : i32, i32
  }
}

</mosaic_0001>

<bundles_post_ra>
// kernel: _quant_conv2d_impl.1
= control target key start
LH: loop header
LB: loop body
LE: loop exit
PB: predicated region body
PF: predicated region fallthrough
CT: control target
= control target key end

     0   :  { %s1514_s15 = smov 0   ;;  %s1516_s16 = smov 0   ;;  %s1689_s0 = inlined_call_operand.vmem [shape: s8[512,128], index: 0, kind: input, shape index: {}]   ;;  %s1690_s1 = inlined_call_operand.vmem [shape: s8[128,128], index: 1, kind: input, shape index: {}]   ;;  %s1691_s2 = inlined_call_operand.vmem [shape: f32[1,128], index: 2, kind: input, shape index: {}]   ;;  %s1692_s3 = inlined_call_operand.vmem [shape: s32[1,128], index: 3, kind: input, shape index: {}]   ;;  %s1693_s4 = inlined_call_operand.vmem [shape: bf16[512,128], index: 4, kind: output, shape index: {}]  }
   0x1   :  { %s1518_s17 = smov 0  }
   0x2 LB: > { %s29_s18 = sadd.s32 1, %s1483_s16  ;;  %p1170_p0 = scmp.ge.s32.totalorder %s1487_s17, 1  ;;  %s1487_s17 = sphi %s1518_s17, %s14_s17   ;;  %s1483_s16 = sphi %s1516_s16, %s1695_s16   ;;  %s1479_s15 = sphi %s1514_s15, %s1694_s15  }
   0x3   : > { %p31_p1 = scmp.ge.s32.totalorder %s29_s18, 2  ;;  %p221_p2 = scmp.lt.s32.totalorder %s1487_s17, 3 }
   0x5   : > { %s1697_s18 = smov (%p31_p1, %s29_s18), 0  ;;  %p222_p3 = pnand %p1170_p0, %p221_p2 }
   0x6   : > { %v401_v0 = vld [vmem:[%s1690_s1] sm:$0xff] (!%p222_p3)  ;;  %s1171_s21 = sshll.u32 (!%p222_p3), %s1479_s15, 5  ;;  %v402_v3 = vld [vmem:[%s1690_s1 + $0x8] sm:$0xff] (!%p222_p3)  ;;  %v403_v14 = vld [vmem:[%s1690_s1 + $0x10] sm:$0xff] (!%p222_p3) }
   0x7   : > { %225 = sbr.rel (%p222_p3) target bundleno = 288 (0x120), region = 36  ;;  %v405_v1 = vunpack.c.l.s8.bf16 (!%p222_p3), %v401_v0  ;;  %v406_v2 = vunpack.c.h.s8.bf16 (!%p222_p3), %v401_v0  ;;  %p268_p4 = scmp.lt.s32.totalorder (!%p222_p3), %s1171_s21, 63  ;;  %v407_v4 = vunpack.c.l.s8.bf16 (!%p222_p3), %v402_v3  ;;  %v408_v12 = vunpack.c.h.s8.bf16 (!%p222_p3), %v402_v3  ;;  %v404_v19 = vld [vmem:[%s1690_s1 + $0x18] sm:$0xff] (!%p222_p3) }
   0x8   : > { %v409_v17 = vunpack.c.l.s8.bf16 (!%p222_p3), %v403_v14  ;;  %v410_v18 = vunpack.c.h.s8.bf16 (!%p222_p3), %v403_v14  ;;  %v411_v20 = vunpack.c.l.s8.bf16 (!%p222_p3), %v404_v19  ;;  %v412_v26 = vunpack.c.h.s8.bf16 (!%p222_p3), %v404_v19 }
   0x9   : > { %1377 = vmatprep.subr.bf16.mxu0 (!%p222_p3), %v405_v1  ;;  %1425 = vmatprep.subr.bf16.mxu1 (!%p222_p3), %v405_v1 }
   0xa   : > { %1378 = vmatpush3.bf16.msra.mxu0 (!%p222_p3), %v405_v1  ;;  %1433 = vmatpush3.bf16.msra.mxu1 (!%p222_p3), %v405_v1 }
   0xb   : > { %1379 = vmatprep.subr.bf16.mxu0 (!%p222_p3), %v406_v2  ;;  %1426 = vmatprep.subr.bf16.mxu1 (!%p222_p3), %v406_v2 }
   0xe   : > { %s1699_s21 = smov (!%p268_p4, %s1171_s21), 63  ;;  %1380 = vmatpush3.bf16.msra.mxu0 %v406_v2  ;;  %1434 = vmatpush3.bf16.msra.mxu1 %v406_v2 }
   0xf   : > { %s1172_s24 = sshll.u32 %s1699_s21, 1  ;;  %1381 = vmatprep.subr.bf16.mxu0 %v407_v4  ;;  %1427 = vmatprep.subr.bf16.mxu1 %v407_v4  ;;  %s1174_s10 = sshll.u32 %s1699_s21, 2 }
  0x10   : > { %s1544_s27 = scalar_lea.vmem %s1689_s0, %s1172_s24  ;;  %s1612_s13 = scalar_lea.vmem %s1693_s4, %s1174_s10 }
  0x11   : > { %v337_v5 = vld [vmem:[%s1544_s27] sm:$0x3]  ;;  %v338_v6 = vld [vmem:[%s1544_s27 + $0x2] sm:$0x3]  ;;  %v339_v21 = vld [vmem:[%s1544_s27 + $0x4] sm:$0x3] }
  0x12   : > { %v353_v7 = vld [vmem:[%s1544_s27 + $0x20] sm:$0x3]  ;;  %v369_v8 = vunpack.c.l.s8.bf16 %v337_v5  ;;  %v370_v9 = vunpack.c.l.s8.bf16 %v338_v6  ;;  %v354_v10 = vld [vmem:[%s1544_s27 + $0x22] sm:$0x3]  ;;  %1382 = vmatpush3.bf16.msra.mxu0 %v407_v4  ;;  %1435 = vmatpush3.bf16.msra.mxu1 %v407_v4  ;;  %v340_v22 = vld [vmem:[%s1544_s27 + $0x6] sm:$0x3]  ;;  %v371_v30 = vunpack.c.l.s8.bf16 %v339_v21 }
  0x13   : > { %v385_v11 = vunpack.c.l.s8.bf16 %v353_v7  ;;  %v386_v13 = vunpack.c.l.s8.bf16 %v354_v10  ;;  %1383 = vmatprep.subr.bf16.mxu0 %v408_v12  ;;  %1428 = vmatprep.subr.bf16.mxu1 %v408_v12  ;;  %v355_v23 = vld [vmem:[%s1544_s27 + $0x24] sm:$0x3]  ;;  %v356_v24 = vld [vmem:[%s1544_s27 + $0x26] sm:$0x3]  ;;  %v341_v25 = vld [vmem:[%s1544_s27 + $0x8] sm:$0x3]  ;;  %v372_v31 = vunpack.c.l.s8.bf16 %v340_v22 }
  0x14   : > { %v1175_v15 = vcombine.low %v369_v8, %v370_v9  ;;  %v342_v27 = vld [vmem:[%s1544_s27 + $0xa] sm:$0x3]  ;;  %v357_v28 = vld [vmem:[%s1544_s27 + $0x28] sm:$0x3]  ;;  %v387_v32 = vunpack.c.l.s8.bf16 %v355_v23  ;;  %v388_v33 = vunpack.c.l.s8.bf16 %v356_v24  ;;  %v373_v34 = vunpack.c.l.s8.bf16 %v341_v25  ;;  %v343_v40 = vld [vmem:[%s1544_s27 + $0xc] sm:$0x3] }
  0x15   : > { %v1183_v16 = vcombine.low %v385_v11, %v386_v13  ;;  %v358_v29 = vld [vmem:[%s1544_s27 + $0x2a] sm:$0x3]  ;;  %v374_v35 = vunpack.c.l.s8.bf16 %v342_v27  ;;  %v389_v36 = vunpack.c.l.s8.bf16 %v357_v28  ;;  %v1176_v38 = vcombine.low %v371_v30, %v372_v31  ;;  %v344_v41 = vld [vmem:[%s1544_s27 + $0xe] sm:$0x3]  ;;  %v359_v44 = vld [vmem:[%s1544_s27 + $0x2c] sm:$0x3] }
  0x16   : > { %1393 = vmatprep.mubr.bf16.mxu0 %v1175_v15  ;;  %1384 = vmatpush3.bf16.msra.mxu0 %v408_v12  ;;  %v390_v37 = vunpack.c.l.s8.bf16 %v358_v29  ;;  %v1184_v39 = vcombine.low %v387_v32, %v388_v33  ;;  %v360_v45 = vld [vmem:[%s1544_s27 + $0x2e] sm:$0x3]  ;;  %v345_v46 = vld [vmem:[%s1544_s27 + $0x10] sm:$0x3]  ;;  %v346_v47 = vld [vmem:[%s1544_s27 + $0x12] sm:$0x3]  ;;  %v375_v50 = vunpack.c.l.s8.bf16 %v343_v40  ;;  %v376_v51 = vunpack.c.l.s8.bf16 %v344_v41 }
  0x17   : > { %1409 = vmatprep.mubr.bf16.mxu1 %v1183_v16  ;;  %1436 = vmatpush3.bf16.msra.mxu1 %v408_v12  ;;  %v1177_v42 = vcombine.low %v373_v34, %v374_v35  ;;  %v361_v48 = vld [vmem:[%s1544_s27 + $0x30] sm:$0x3]  ;;  %v362_v49 = vld [vmem:[%s1544_s27 + $0x32] sm:$0x3]  ;;  %v391_v52 = vunpack.c.l.s8.bf16 %v359_v44  ;;  %v392_v53 = vunpack.c.l.s8.bf16 %v360_v45  ;;  %v377_v54 = vunpack.c.l.s8.bf16 %v345_v46  ;;  %v347_v60 = vld [vmem:[%s1544_s27 + $0x14] sm:$0x3] }
  0x18   : > { %1385 = vmatprep.subr.bf16.mxu0 %v409_v17  ;;  %1429 = vmatprep.subr.bf16.mxu1 %v409_v17  ;;  %v1185_v43 = vcombine.low %v389_v36, %v390_v37  ;;  %v378_v55 = vunpack.c.l.s8.bf16 %v346_v47  ;;  %v393_v56 = vunpack.c.l.s8.bf16 %v361_v48  ;;  %v394_v57 = vunpack.c.l.s8.bf16 %v362_v49  ;;  %v348_v61 = vld [vmem:[%s1544_s27 + $0x16] sm:$0x3]  ;;  %v363_v0 = vld [vmem:[%s1544_s27 + $0x34] sm:$0x3]  ;;  %v349_v2 = vld [vmem:[%s1544_s27 + $0x18] sm:$0x3] }
  0x19   : > { %v1178_v58 = vcombine.low %v375_v50, %v376_v51  ;;  %v1186_v59 = vcombine.low %v391_v52, %v392_v53  ;;  %v364_v1 = vld [vmem:[%s1544_s27 + $0x36] sm:$0x3]  ;;  %v350_v3 = vld [vmem:[%s1544_s27 + $0x1a] sm:$0x3]  ;;  %v365_v4 = vld [vmem:[%s1544_s27 + $0x38] sm:$0x3]  ;;  %v379_v6 = vunpack.c.l.s8.bf16 %v347_v60  ;;  %v380_v7 = vunpack.c.l.s8.bf16 %v348_v61 }
  0x1a   : > { %1386 = vmatpush3.bf16.msra.mxu0 %v409_v17  ;;  %v1179_v62 = vcombine.low %v377_v54, %v378_v55  ;;  %v1187_v63 = vcombine.low %v393_v56, %v394_v57  ;;  %v366_v5 = vld [vmem:[%s1544_s27 + $0x3a] sm:$0x3]  ;;  %v395_v8 = vunpack.c.l.s8.bf16 %v363_v0  ;;  %v396_v9 = vunpack.c.l.s8.bf16 %v364_v1  ;;  %v351_v16 = vld [vmem:[%s1544_s27 + $0x1c] sm:$0x3]  ;;  %v352_v19 = vld [vmem:[%s1544_s27 + $0x1e] sm:$0x3] }
  0x1b   : > { %1437 = vmatpush3.bf16.msra.mxu1 %v409_v17  ;;  %1387 = vmatprep.subr.bf16.mxu0 %v410_v18  ;;  %v381_v10 = vunpack.c.l.s8.bf16 %v349_v2  ;;  %v382_v11 = vunpack.c.l.s8.bf16 %v350_v3  ;;  %v397_v12 = vunpack.c.l.s8.bf16 %v365_v4  ;;  %v398_v13 = vunpack.c.l.s8.bf16 %v366_v5  ;;  %v368_v21 = vld [vmem:[%s1544_s27 + $0x3e] sm:$0x3]  ;;  %v801_v30 = vld [vmem:[%s1692_s3] sm:$0x1] }
  0x1c   : > { %1430 = vmatprep.subr.bf16.mxu1 %v410_v18  ;;  %v1180_v14 = vcombine.low %v379_v6, %v380_v7  ;;  %v1188_v15 = vcombine.low %v395_v8, %v396_v9  ;;  %v383_v22 = vunpack.c.l.s8.bf16 %v351_v16  ;;  %v384_v23 = vunpack.c.l.s8.bf16 %v352_v19  ;;  %v1594_v40 = vld [vmem:[%s1691_s2] ss:$0 sm:$0xff] }
  0x1d   : > { %v1181_v17 = vcombine.low %v381_v10, %v382_v11  ;;  %v400_v25 = vunpack.c.l.s8.bf16 %v368_v21  ;;  %v804_v28 = vlaneseq  ;;  %v802_v31 = vcvt.s32.f32 %v801_v30 }
  0x1e   : > { %1388 = vmatpush3.bf16.msra.mxu0 %v410_v18 }
  0x1f   : > { %1438 = vmatpush3.bf16.msra.mxu1 %v410_v18  ;;  %1389 = vmatprep.subr.bf16.mxu0 %v411_v20  ;;  %v1189_v18 = vcombine.low %v397_v12, %v398_v13  ;;  %v805_v29 = vshrl.u32 %v804_v28, 7 }
  0x20   : > { %1431 = vmatprep.subr.bf16.mxu1 %v411_v20 }
  0x21   : > { %v806_v32 = vsub.s32 0, %v805_v29 }
  0x22   : > { %1390 = vmatpush3.bf16.msra.mxu0 %v411_v20 }
  0x23   : > { %1439 = vmatpush3.bf16.msra.mxu1 %v411_v20  ;;  %1391 = vmatprep.subr.bf16.mxu0 %v412_v26  ;;  %v367_v20 = vld [vmem:[%s1544_s27 + $0x3c] sm:$0x3]  ;;  %v1587_v33 = vrot.slane %v802_v31, %v806_v32 }
  0x24   : > { %1432 = vmatprep.subr.bf16.mxu1 %v412_v26  ;;  %v399_v24 = vunpack.c.l.s8.bf16 %v367_v20 }
  0x26   : > { %1392 = vmatpush3.bf16.msra.mxu0 %v412_v26  ;;  %v1190_v27 = vcombine.low %v399_v24, %v400_v25 }
  0x27   : > { %1440 = vmatpush3.bf16.msra.mxu1 %v412_v26  ;;  %v1182_v26 = vcombine.low %v383_v22, %v384_v23 }
  0x29   : > { %1394 = vmatmul.mubr.bf16.vlgmr.msra.gmra.mrb[0].mxu0 %v1176_v38 }
  0x2a   : > { %1410 = vmatmul.mubr.bf16.vlgmr.msra.gmra.mrb[0].mxu1 %v1184_v39  ;;  %1397 = vmatprep.mubr.bf16.mxu0 %v1177_v42 }
  0x2b   : > { %1413 = vmatprep.mubr.bf16.mxu1 %v1185_v43 }
  0x31   : > { %1398 = vmatmul.mubr.bf16.gmra.mrb[4].mxu0 %v1178_v58 }
  0x32   : > { %1414 = vmatmul.mubr.bf16.gmra.mrb[4].mxu1 %v1186_v59  ;;  %1401 = vmatprep.mubr.bf16.mxu0 %v1179_v62 }
  0x33   : > { %1417 = vmatprep.mubr.bf16.mxu1 %v1187_v63 }
  0x39   : > { %1402 = vmatmul.mubr.bf16.gmra.mrb[8].mxu0 %v1180_v14 }
  0x3a   : > { %1418 = vmatmul.mubr.bf16.gmra.mrb[8].mxu1 %v1188_v15  ;;  %1405 = vmatprep.mubr.bf16.mxu0 %v1181_v17 }
  0x3b   : > { %1421 = vmatprep.mubr.bf16.mxu1 %v1189_v18 }
  0x41   : > { %1406 = vmatmul.mubr.bf16.gmra.mrb[12].mxu0 %v1182_v26 }
  0x42   : > { %1422 = vmatmul.mubr.bf16.gmra.mrb[12].mxu1 %v1190_v27 }
  0xfc   : > { %v1395_v34 = vpop.f32.mrb[0].mxu0 }
  0xfd   : > { %v1411_v35 = vpop.f32.mrb[0].mxu1  ;;  %v811_v36 = vadd.f32 %v1395_v34, %v1587_v33  ;;  %v575_v38 = vpop.f32.mrb[1].mxu0 }
  0xfe   : > { %v827_v37 = vadd.f32 %v1411_v35, %v1587_v33  ;;  %v639_v39 = vpop.f32.mrb[1].mxu1  ;;  %v809_v41 = vadd.f32 %v1587_v33, %v575_v38  ;;  %v1396_v43 = vpop.f32.mrb[2].mxu0 }
  0xff   : > { %v825_v42 = vadd.f32 %v1587_v33, %v639_v39  ;;  %v1412_v44 = vpop.f32.mrb[2].mxu1  ;;  %v812_v45 = vadd.f32 %v1396_v43, %v1587_v33  ;;  %v578_v47 = vpop.f32.mrb[3].mxu0  ;;  %v850_v51 = vmul.f32 %v1594_v40, %v811_v36 }
 0x100   : > { %v828_v46 = vadd.f32 %v1412_v44, %v1587_v33  ;;  %v642_v48 = vpop.f32.mrb[3].mxu1  ;;  %v810_v49 = vadd.f32 %v1587_v33, %v578_v47  ;;  %v866_v52 = vmul.f32 %v1594_v40, %v827_v37  ;;  %v848_v55 = vmul.f32 %v1594_v40, %v809_v41 }
 0x101   : > { %v826_v50 = vadd.f32 %v1587_v33, %v642_v48  ;;  %v851_v53 = vmul.f32 %v1594_v40, %v812_v45  ;;  %v864_v56 = vmul.f32 %v1594_v40, %v825_v42 }
 0x102   : > { %v867_v54 = vmul.f32 %v1594_v40, %v828_v46  ;;  %v849_v57 = vmul.f32 %v1594_v40, %v810_v49 }
 0x103   : > { %v865_v58 = vmul.f32 %v1594_v40, %v826_v50  ;;  %v1266_v59 = vpack.c.bf16 %v851_v53, %v850_v51 }
 0x104   : > { %v1306_v60 = vpack.c.bf16 %v867_v54, %v866_v52  ;;  %v1261_v61 = vpack.c.bf16 %v849_v57, %v848_v55  ;;  %v1399_v63 = vpop.f32.mrb[4].mxu0 }
 0x105   : > { %v1301_v62 = vpack.c.bf16 %v865_v58, %v864_v56  ;;  %v1415_v0 = vpop.f32.mrb[4].mxu1  ;;  %1338 = vst [vmem:[%s1612_s13 + $0x8] sm:$0xff] %v1266_v59   ;;  %v815_v1 = vadd.f32 %v1399_v63, %v1587_v33  ;;  %v591_v3 = vpop.f32.mrb[5].mxu0 }
 0x106   : > { %1346 = vst [vmem:[%s1612_s13 + $0x48] sm:$0xff] %v1306_v60   ;;  %v831_v2 = vadd.f32 %v1415_v0, %v1587_v33  ;;  %v655_v4 = vpop.f32.mrb[5].mxu1  ;;  %1262 = vst [vmem:[%s1612_s13] sm:$0xff] %v1261_v61   ;;  %v813_v5 = vadd.f32 %v1587_v33, %v591_v3  ;;  %v1400_v7 = vpop.f32.mrb[6].mxu0 }
 0x107   : > { %1345 = vst [vmem:[%s1612_s13 + $0x40] sm:$0xff] %v1301_v62   ;;  %v829_v6 = vadd.f32 %v1587_v33, %v655_v4  ;;  %v1416_v8 = vpop.f32.mrb[6].mxu1  ;;  %v816_v9 = vadd.f32 %v1400_v7, %v1587_v33  ;;  %v594_v11 = vpop.f32.mrb[7].mxu0  ;;  %v854_v15 = vmul.f32 %v1594_v40, %v815_v1 }
 0x108   : > { %v832_v10 = vadd.f32 %v1416_v8, %v1587_v33  ;;  %v658_v12 = vpop.f32.mrb[7].mxu1  ;;  %v814_v13 = vadd.f32 %v1587_v33, %v594_v11  ;;  %v870_v16 = vmul.f32 %v1594_v40, %v831_v2  ;;  %v852_v19 = vmul.f32 %v1594_v40, %v813_v5 }
 0x109   : > { %v830_v14 = vadd.f32 %v1587_v33, %v658_v12  ;;  %v855_v17 = vmul.f32 %v1594_v40, %v816_v9  ;;  %v868_v20 = vmul.f32 %v1594_v40, %v829_v6 }
 0x10a   : > { %v871_v18 = vmul.f32 %v1594_v40, %v832_v10  ;;  %v853_v21 = vmul.f32 %v1594_v40, %v814_v13 }
 0x10b   : > { %v869_v22 = vmul.f32 %v1594_v40, %v830_v14  ;;  %v1276_v23 = vpack.c.bf16 %v855_v17, %v854_v15 }
 0x10c   : > { %v1316_v24 = vpack.c.bf16 %v871_v18, %v870_v16  ;;  %v1271_v25 = vpack.c.bf16 %v853_v21, %v852_v19  ;;  %v1403_v27 = vpop.f32.mrb[8].mxu0 }
 0x10d   : > { %v1311_v26 = vpack.c.bf16 %v869_v22, %v868_v20  ;;  %v1419_v28 = vpop.f32.mrb[8].mxu1  ;;  %1340 = vst [vmem:[%s1612_s13 + $0x18] sm:$0xff] %v1276_v23   ;;  %v819_v29 = vadd.f32 %v1403_v27, %v1587_v33  ;;  %v607_v31 = vpop.f32.mrb[9].mxu0 }
 0x10e   : > { %1348 = vst [vmem:[%s1612_s13 + $0x58] sm:$0xff] %v1316_v24   ;;  %v835_v30 = vadd.f32 %v1419_v28, %v1587_v33  ;;  %v671_v32 = vpop.f32.mrb[9].mxu1  ;;  %1339 = vst [vmem:[%s1612_s13 + $0x10] sm:$0xff] %v1271_v25   ;;  %v817_v34 = vadd.f32 %v1587_v33, %v607_v31  ;;  %v1404_v36 = vpop.f32.mrb[10].mxu0 }
 0x10f   : > { %1347 = vst [vmem:[%s1612_s13 + $0x50] sm:$0xff] %v1311_v26   ;;  %v833_v35 = vadd.f32 %v1587_v33, %v671_v32  ;;  %v1420_v37 = vpop.f32.mrb[10].mxu1  ;;  %v820_v38 = vadd.f32 %v1404_v36, %v1587_v33  ;;  %v610_v41 = vpop.f32.mrb[11].mxu0  ;;  %v858_v45 = vmul.f32 %v1594_v40, %v819_v29 }
 0x110   : > { %v836_v39 = vadd.f32 %v1420_v37, %v1587_v33  ;;  %v674_v42 = vpop.f32.mrb[11].mxu1  ;;  %v818_v43 = vadd.f32 %v1587_v33, %v610_v41  ;;  %v874_v46 = vmul.f32 %v1594_v40, %v835_v30  ;;  %v856_v49 = vmul.f32 %v1594_v40, %v817_v34 }
 0x111   : > { %v834_v44 = vadd.f32 %v1587_v33, %v674_v42  ;;  %v859_v47 = vmul.f32 %v1594_v40, %v820_v38  ;;  %v872_v50 = vmul.f32 %v1594_v40, %v833_v35 }
 0x112   : > { %v875_v48 = vmul.f32 %v1594_v40, %v836_v39  ;;  %v857_v51 = vmul.f32 %v1594_v40, %v818_v43 }
 0x113   : > { %v873_v52 = vmul.f32 %v1594_v40, %v834_v44  ;;  %v1286_v53 = vpack.c.bf16 %v859_v47, %v858_v45 }
 0x114   : > { %v1326_v54 = vpack.c.bf16 %v875_v48, %v874_v46  ;;  %v1281_v55 = vpack.c.bf16 %v857_v51, %v856_v49  ;;  %v1407_v57 = vpop.f32.mrb[12].mxu0 }
 0x115   : > { %v1321_v56 = vpack.c.bf16 %v873_v52, %v872_v50  ;;  %v1423_v58 = vpop.f32.mrb[12].mxu1  ;;  %1342 = vst [vmem:[%s1612_s13 + $0x28] sm:$0xff] %v1286_v53   ;;  %v823_v59 = vadd.f32 %v1407_v57, %v1587_v33  ;;  %v623_v61 = vpop.f32.mrb[13].mxu0 }
 0x116   : > { %1350 = vst [vmem:[%s1612_s13 + $0x68] sm:$0xff] %v1326_v54   ;;  %v839_v60 = vadd.f32 %v1423_v58, %v1587_v33  ;;  %v687_v62 = vpop.f32.mrb[13].mxu1  ;;  %1341 = vst [vmem:[%s1612_s13 + $0x20] sm:$0xff] %v1281_v55   ;;  %v821_v63 = vadd.f32 %v1587_v33, %v623_v61  ;;  %v1408_v1 = vpop.f32.mrb[14].mxu0 }
 0x117   : > { %1349 = vst [vmem:[%s1612_s13 + $0x60] sm:$0xff] %v1321_v56   ;;  %v837_v0 = vadd.f32 %v1587_v33, %v687_v62  ;;  %v1424_v2 = vpop.f32.mrb[14].mxu1  ;;  %v824_v3 = vadd.f32 %v1408_v1, %v1587_v33  ;;  %v626_v5 = vpop.f32.mrb[15].mxu0  ;;  %v862_v9 = vmul.f32 %v1594_v40, %v823_v59 }
 0x118   : > { %v840_v4 = vadd.f32 %v1424_v2, %v1587_v33  ;;  %v690_v6 = vpop.f32.mrb[15].mxu1  ;;  %v822_v7 = vadd.f32 %v1587_v33, %v626_v5  ;;  %v878_v10 = vmul.f32 %v1594_v40, %v839_v60  ;;  %v860_v13 = vmul.f32 %v1594_v40, %v821_v63 }
 0x119   : > { %v838_v8 = vadd.f32 %v1587_v33, %v690_v6  ;;  %v863_v11 = vmul.f32 %v1594_v40, %v824_v3  ;;  %v876_v14 = vmul.f32 %v1594_v40, %v837_v0 }
 0x11a   : > { %v879_v12 = vmul.f32 %v1594_v40, %v840_v4  ;;  %v861_v15 = vmul.f32 %v1594_v40, %v822_v7 }
 0x11b   : > { %v877_v16 = vmul.f32 %v1594_v40, %v838_v8  ;;  %v1296_v17 = vpack.c.bf16 %v863_v11, %v862_v9 }
 0x11c   : > { %v1336_v18 = vpack.c.bf16 %v879_v12, %v878_v10  ;;  %v1291_v33 = vpack.c.bf16 %v861_v15, %v860_v13 }
 0x11d   : > { %v1331_v19 = vpack.c.bf16 %v877_v16, %v876_v14  ;;  %1344 = vst [vmem:[%s1612_s13 + $0x38] sm:$0xff] %v1296_v17  }
 0x11e   : > { %1352 = vst [vmem:[%s1612_s13 + $0x78] sm:$0xff] %v1336_v18   ;;  %1343 = vst [vmem:[%s1612_s13 + $0x30] sm:$0xff] %v1291_v33  }
 0x11f   : > { %1351 = vst [vmem:[%s1612_s13 + $0x70] sm:$0xff] %v1331_v19  }
 0x120 PF: > { %s14_s17 = sadd.s32 1, %s1487_s17   ;;  %s1694_s15 = smov %s1483_s16 }
 0x121   : > { %p11_p5 = scmp.ge.s32.totalorder %s14_s17, 4   ;;  %s1695_s16 = smov %s1697_s18 }
 0x123   :  { %13 = sbr.rel (!%p11_p5) target bundleno = 2 (0x2), region = 83 }

</bundles_post_ra>
